<compile_context>
chip_gen: v7x
topology: tpu7x:2x2x1
jax: 0.10.0
libtpu: 0.0.40
codegen_flags: <defaults>
</compile_context>

<pallas_src>
import functools

import jax
import jax.numpy as jnp
import numpy as np
from jax import lax
from jax.experimental import pallas as pl
from jax.experimental.pallas import tpu as pltpu

EPS = 1e-6        # matches the torch module's eps
NORM_EPS = 1e-12  # guard for rsqrt on all-zero columns (bare 1/norm would be inf)

_MIB = 1024 * 1024


def _dot_nt(a, b):
    # a @ b.T, contracting the last (lane) dims, f32 accumulation on the MXU.
    return lax.dot_general(a, b, (((1,), (1,)), ((), ())),
                           preferred_element_type=jnp.float32)


def _af_kernel(x1_ref, x2_ref, w_ref, b_ref, gcla_ref, gpla_ref, out_ref,
               *, ck, c, bt, b_total):
    n = x1_ref.shape[-1]          # true H*W (no padding anywhere)
    n_f = jnp.float32(n)
    g_cla = gcla_ref[0]
    g_pla = gpla_ref[0]

    w_bf = w_ref[...]                                          # (2ck+c+1, c), bf16 (pre-cast)
    # Hoist the bias broadcast out of the batch loop (JAX does not CSE it).
    bias = jnp.broadcast_to(b_ref[...], (w_bf.shape[0], n))    # (2ck+c+1, n), f32

    def process(b):
        x = x1_ref[b].astype(jnp.float32) + x2_ref[b].astype(jnp.float32)   # (c, n)
        x_bf = x.astype(jnp.bfloat16)

        # One stacked MXU push: [Q; K; V; channel_sum] = [Wq; Wk; Wv; 1] @ x + [bq; bk; bv; 0]
        qkv = jnp.dot(w_bf, x_bf, preferred_element_type=jnp.float32) + bias  # (2ck+c+1, n)
        q = qkv[:ck]                              # (ck, n)
        k = qkv[ck:2 * ck]                        # (ck, n)
        v = qkv[2 * ck:2 * ck + c]                # (c,  n)
        vsum_c = qkv[2 * ck + c:2 * ck + c + 1]   # (1,  n) == sum over channels of x

        # ---------------- Channel Linear Attention ----------------
        inv_norm_c = lax.rsqrt(jnp.sum(x * x, axis=0, keepdims=True) + NORM_EPS)
        qc = x * inv_norm_c                                                   # normalized Q == K
        qc_bf = qc.astype(jnp.bfloat16)
        sum_q = jnp.sum(qc, axis=0, keepdims=True) + EPS                      # (1, n)
        tailor_c = pl.reciprocal(
            n_f + jnp.sum(qc * sum_q, axis=1, keepdims=True), approx=True)    # (c, 1)
        mat_c = _dot_nt(x_bf, qc_bf)                                          # (c, c) = V @ K^T
        msum_c = vsum_c + jnp.dot(mat_c.astype(jnp.bfloat16), qc_bf,
                                  preferred_element_type=jnp.float32)         # (c, n)
        out_cla = x + g_cla * (msum_c * tailor_c)

        # ---------------- Position Linear Attention ----------------
        qn = q * lax.rsqrt(jnp.sum(q * q, axis=0, keepdims=True) + NORM_EPS)
        kn = k * lax.rsqrt(jnp.sum(k * k, axis=0, keepdims=True) + NORM_EPS)
        sum_k = jnp.sum(kn, axis=1, keepdims=True) + EPS                      # (ck, 1)
        tailor_p = pl.reciprocal(
            n_f + jnp.sum(qn * sum_k, axis=0, keepdims=True), approx=True)    # (1, n)
        vsum_p = jnp.sum(v, axis=1, keepdims=True)                            # (c, 1)
        # matrix^T = (K @ V^T)^T = V @ K^T, shape (c, ck); then (c, ck) @ (ck, n)
        mat_p_t = _dot_nt(v.astype(jnp.bfloat16), kn.astype(jnp.bfloat16))    # (c, ck)
        msum_p = vsum_p + jnp.dot(mat_p_t.astype(jnp.bfloat16),
                                  qn.astype(jnp.bfloat16),
                                  preferred_element_type=jnp.float32)         # (c, n)
        out_pla = x + g_pla * (msum_p * tailor_p)

        out_ref[b] = (out_cla + out_pla).astype(out_ref.dtype)

    if bt == 1:
        process(0)
        return

    if b_total % bt == 0:
        def body(b, carry):
            process(b)
            return carry
    else:
        # Masked tail block: rows past b_total are never read or written
        # (Pallas drops the out-of-bounds portion of the output block anyway).
        n_valid = b_total - pl.program_id(0) * bt

        def body(b, carry):
            @pl.when(b < n_valid)
            def _():
                process(b)
            return carry

    # fori_loop bounds live ranges to one batch; mild unroll only for bigger blocks.
    lax.fori_loop(0, bt, body, 0, unroll=2 if bt >= 4 else 1)


def _tpu_vmem_capacity_bytes():
    try:
        return int(pltpu.get_tpu_info().vmem_capacity_bytes)
    except Exception:
        return 64 * _MIB   # conservative default (v7x-sized VMEM)


def _pick_block_batches(B, per_batch, fixed, budget, two_tc):
    max_bt = int(max(1, min(B, (budget - fixed) // max(per_batch, 1))))
    if two_tc and B >= 2:
        # Keep >= 2 grid steps so both v7x TensorCores get work.
        max_bt = min(max_bt, (B + 1) // 2)
    best, best_key = 1, None
    for cand in range(1, max_bt + 1):
        steps = -(-B // cand)
        key = (cand * 2 >= max_bt,                 # big enough block (amortize step overhead)
               B % cand == 0,                      # no masked tail block
               (steps % 2 == 0) or not two_tc,     # balanced split across the two v7x TCs
               cand)                               # then: biggest
        if best_key is None or key > best_key:
            best, best_key = cand, key
    return best


@functools.partial(jax.jit, static_argnames=("block_batches",))
def af_module(x1, x2, wq, bq, wk, bk, wv, bv, gcla, gpla, block_batches=None):
    B, C, H, W = x1.shape
    N = H * W
    ck = wq.shape[0]
    cqkv = 2 * ck + C + 1              # Q rows, K rows, V rows, plus one channel-sum row
    in_dtype = x1.dtype

    # No HBM padding and no output slice: the blocks use the full (unpadded)
    # C and N dims, so reshape is the only wrapper-side op (free on contiguous data).
    x1f = x1.reshape(B, C, N)
    x2f = x2.reshape(B, C, N)

    # Fused 1x1-conv weights [Wq; Wk; Wv; ones] pre-cast to bf16; the trailing
    # ones-row makes the CLA channel-sum fall out of the same MXU matmul.
    wqkv = jnp.concatenate([wq, wk, wv, jnp.ones((1, C), jnp.float32)],
                           axis=0).astype(jnp.bfloat16)                        # (cqkv, C)
    bqkv = jnp.concatenate([bq, bk, bv, jnp.zeros((1, 1), jnp.float32)],
                           axis=0).astype(jnp.float32)                         # (cqkv, 1)

    # ---- batch-block / VMEM budgeting (chip aware) -------------------------
    vmem_cap = _tpu_vmem_capacity_bytes()
    two_tc = vmem_cap <= 64 * _MIB                 # v7x-like: 2 TCs, 64 MiB VMEM
    budget = (24 if two_tc else 48) * _MIB         # bigger blocks on 128-MiB v5e/v6e
    itemsize = jnp.dtype(in_dtype).itemsize
    per_batch = 3 * 2 * C * N * itemsize           # x1, x2, out blocks, double-buffered
    fixed = cqkv * C * 2 + cqkv * 4 + 16 * C * N * 4   # params + one batch's f32 temps

    if block_batches is not None:
        bt = int(max(1, min(block_batches, B)))
    else:
        bt = _pick_block_batches(B, per_batch, fixed, budget, two_tc)

    num_blocks = -(-B // bt)
    footprint = bt * per_batch + fixed             # already includes double-buffering
    vmem_cap_limit = 48 * _MIB if two_tc else 96 * _MIB
    vmem_limit = int(min(vmem_cap_limit,
                         max(16 * _MIB, footprint + footprint // 4 + 2 * _MIB)))

    xspec = pl.BlockSpec((bt, C, N), lambda i: (i, 0, 0))
    wspec = pl.BlockSpec((cqkv, C), lambda i: (0, 0))
    bspec = pl.BlockSpec((cqkv, 1), lambda i: (0, 0))
    smem_spec = pl.BlockSpec(memory_space=pltpu.MemorySpace.SMEM)

    kernel = functools.partial(_af_kernel, ck=ck, c=C, bt=bt, b_total=B)
    out = pl.pallas_call(
        kernel,
        out_shape=jax.ShapeDtypeStruct((B, C, N), in_dtype),
        grid=(num_blocks,),
        in_specs=[xspec, xspec, wspec, bspec, smem_spec, smem_spec],
        out_specs=xspec,
        compiler_params=pltpu.CompilerParams(
            dimension_semantics=("parallel",),
            vmem_limit_bytes=vmem_limit),
    )(x1f, x2f, wqkv, bqkv,
      gcla.astype(jnp.float32), gpla.astype(jnp.float32))

    return out.reshape(B, C, H, W)


# ------------------------ pure-JAX reference ------------------------
def _l2n(t):  # normalize over dim -2 (channels), matching torch l2_norm
    return t * (1.0 / jnp.linalg.norm(t, axis=-2))[:, None, :]


def _cla_ref(x, gamma):
    B, C, H, W = x.shape
    N = W * H
    xf = x.reshape(B, C, N)
    Qn = _l2n(xf)
    Kn = jnp.transpose(_l2n(xf), (0, 2, 1))                                  # (B, N, C)
    tailor = 1.0 / (N + jnp.einsum('bnc,bn->bc', Kn, jnp.sum(Qn, axis=-2) + EPS))
    value_sum = jnp.sum(xf, axis=1)[:, None, :]                              # (B, 1, N)
    matrix = jnp.einsum('bcn,bnm->bcm', xf, Kn)
    matrix_sum = value_sum + jnp.einsum('bcm,bmn->bcn', matrix, Qn)
    weight_value = matrix_sum * tailor[:, :, None]
    return x + gamma * weight_value.reshape(B, C, H, W)


def _pla_ref(x, wq, bq, wk, bk, wv, bv, gamma):
    B, C, H, W = x.shape
    N = W * H
    xf = x.reshape(B, C, N)
    Q = jnp.einsum('oc,bcn->bon', wq, xf) + bq[None, :, :]
    K = jnp.einsum('oc,bcn->bon', wk, xf) + bk[None, :, :]
    V = jnp.einsum('oc,bcn->bon', wv, xf) + bv[None, :, :]
    Qn = jnp.transpose(_l2n(Q), (0, 2, 1))                                   # (B, N, Ck)
    Kn = _l2n(K)                                                             # (B, Ck, N)
    tailor = 1.0 / (N + jnp.einsum('bnc,bc->bn', Qn, jnp.sum(Kn, axis=-1) + EPS))
    value_sum = jnp.sum(V, axis=-1)[:, :, None]                              # (B, C, 1)
    matrix = jnp.einsum('bmn,bcn->bmc', Kn, V)                               # (B, Ck, C)
    matrix_sum = value_sum + jnp.einsum('bnm,bmc->bcn', Qn, matrix)
    weight_value = matrix_sum * tailor[:, None, :]
    return x + gamma * weight_value.reshape(B, C, H, W)


def af_reference(x1, x2, wq, bq, wk, bk, wv, bv, gcla, gpla):
    x = x1 + x2
    with jax.default_matmul_precision("highest"):
        return _cla_ref(x, gcla[0]) + _pla_ref(x, wq, bq, wk, bk, wv, bv, gpla[0])


if __name__ == "__main__":
    def run_case(B, C, H, W, dtype, rtol, atol, block_batches=None):
        Ck = max(1, C // 8)
        key = jax.random.PRNGKey(0)
        ks = jax.random.split(key, 8)
        # Deterministic synthetic parameters (Conv2d 1x1 weights flattened to (out, in)).
        wq = 0.2 * jax.random.normal(ks[0], (Ck, C), jnp.float32)
        bq = 0.1 * jax.random.normal(ks[1], (Ck, 1), jnp.float32)
        wk = 0.2 * jax.random.normal(ks[2], (Ck, C), jnp.float32)
        bk = 0.1 * jax.random.normal(ks[3], (Ck, 1), jnp.float32)
        wv = 0.2 * jax.random.normal(ks[4], (C, C), jnp.float32)
        bv = 0.1 * jax.random.normal(ks[5], (C, 1), jnp.float32)
        # nn.Parameter(torch.zeros(1)) would zero out the attention paths; use
        # deterministic non-zero gammas so the kernel path is actually exercised.
        gcla = jnp.array([0.7], jnp.float32)
        gpla = jnp.array([0.4], jnp.float32)

        x1 = jax.random.normal(ks[6], (B, C, H, W), jnp.float32).astype(dtype)
        x2 = jax.random.normal(ks[7], (B, C, H, W), jnp.float32).astype(dtype)

        out = af_module(x1, x2, wq, bq, wk, bk, wv, bv, gcla, gpla,
                        block_batches=block_batches)
        out = jax.block_until_ready(out)

        ref = af_reference(x1.astype(jnp.float32), x2.astype(jnp.float32),
                           wq, bq, wk, bk, wv, bv, gcla, gpla)
        np.testing.assert_allclose(np.asarray(out).astype(np.float32),
                                   np.asarray(ref), rtol=rtol, atol=atol)

    # Main case: lane-dense N = 256.
    run_case(2, 16, 16, 16, jnp.float32, 2e-2, 2e-2)
    # Ragged spatial size: N = 196 stays unpadded end-to-end (no extra HBM passes).
    run_case(2, 16, 14, 14, jnp.float32, 2e-2, 2e-2)
    # Native bf16 in / bf16 out path.
    run_case(2, 16, 16, 16, jnp.bfloat16, 1e-1, 1e-1)
    # Batch not divisible by the batch block: masked tail block path.
    run_case(3, 16, 16, 16, jnp.float32, 2e-2, 2e-2, block_batches=2)

    print("KERNEL_OK")
</pallas_src>

<mosaic_0001>
module attributes {stable_mosaic.version = 11 : i64} {
  func.func @_af_kernel(%arg0: i32, %arg1: memref<1x16x256xf32, #tpu.memory_space<vmem>>, %arg2: memref<1x16x256xf32, #tpu.memory_space<vmem>>, %arg3: memref<21x16xbf16, #tpu.memory_space<vmem>>, %arg4: memref<21x1xf32, #tpu.memory_space<vmem>>, %arg5: memref<1xf32, #tpu.memory_space<smem>>, %arg6: memref<1xf32, #tpu.memory_space<smem>>, %arg7: memref<1x16x256xf32, #tpu.memory_space<vmem>>) attributes {dimension_semantics = [#tpu.dimension_semantics<parallel>], iteration_bounds = array<i64: 2>, scalar_prefetch = 0 : i64, scratch_operands = 0 : i64, tpu.core_type = #tpu.core_type<tc>, window_params = [{transform_indices = @transform_0, window_bounds = array<i64: 1, 16, 256>}, {transform_indices = @transform_1, window_bounds = array<i64: 1, 16, 256>}, {pipeline_mode = #tpu.pipeline_mode<synchronous>, transform_indices = @transform_2, window_bounds = array<i64: 21, 16>}, {pipeline_mode = #tpu.pipeline_mode<synchronous>, transform_indices = @transform_3, window_bounds = array<i64: 21, 1>}, {transform_indices = @transform_4, window_bounds = array<i64: 1>}, {transform_indices = @transform_5, window_bounds = array<i64: 1>}, {transform_indices = @transform_6, window_bounds = array<i64: 1, 16, 256>}]} {
    %c0 = arith.constant 0 : index
    %0 = memref.load %arg5[%c0] : memref<1xf32, #tpu.memory_space<smem>>
    %c0_0 = arith.constant 0 : index
    %1 = memref.load %arg6[%c0_0] : memref<1xf32, #tpu.memory_space<smem>>
    %c0_1 = arith.constant 0 : index
    %c0_2 = arith.constant 0 : index
    %2 = vector.load %arg3[%c0_1, %c0_2] : memref<21x16xbf16, #tpu.memory_space<vmem>>, vector<21x16xbf16>
    %c0_3 = arith.constant 0 : index
    %c0_4 = arith.constant 0 : index
    %3 = vector.load %arg4[%c0_3, %c0_4] : memref<21x1xf32, #tpu.memory_space<vmem>>, vector<21x1xf32>
    %4 = vector.shape_cast %3 : vector<21x1xf32> to vector<21x1xf32>
    %5 = vector.broadcast %4 : vector<21x1xf32> to vector<21x256xf32>
    %c0_5 = arith.constant 0 : index
    %c0_6 = arith.constant 0 : index
    %c0_7 = arith.constant 0 : index
    %6 = vector.load %arg1[%c0_5, %c0_6, %c0_7] : memref<1x16x256xf32, #tpu.memory_space<vmem>>, vector<1x16x256xf32>
    %7 = vector.shape_cast %6 : vector<1x16x256xf32> to vector<16x256xf32>
    %c0_8 = arith.constant 0 : index
    %c0_9 = arith.constant 0 : index
    %c0_10 = arith.constant 0 : index
    %8 = vector.load %arg2[%c0_8, %c0_9, %c0_10] : memref<1x16x256xf32, #tpu.memory_space<vmem>>, vector<1x16x256xf32>
    %9 = vector.shape_cast %8 : vector<1x16x256xf32> to vector<16x256xf32>
    %10 = arith.addf %7, %9 : vector<16x256xf32>
    %11 = arith.truncf %10 : vector<16x256xf32> to vector<16x256xbf16>
    %cst = arith.constant dense<0.000000e+00> : vector<21x256xf32>
    %12 = tpu.matmul %2, %11, %cst {dimension_numbers = #tpu.dot_dimension_numbers<[1], [0], [0], [1], [0, 0, 1, 1], [], []>} : vector<21x16xbf16>, vector<16x256xbf16>, vector<21x256xf32> -> vector<21x256xf32>
    %13 = arith.addf %12, %5 : vector<21x256xf32>
    %14 = vector.extract_strided_slice %13 {offsets = [0, 0], sizes = [2, 256], strides = [1, 1]} : vector<21x256xf32> to vector<2x256xf32>
    %15 = vector.extract_strided_slice %13 {offsets = [2, 0], sizes = [2, 256], strides = [1, 1]} : vector<21x256xf32> to vector<2x256xf32>
    %16 = vector.extract_strided_slice %13 {offsets = [4, 0], sizes = [16, 256], strides = [1, 1]} : vector<21x256xf32> to vector<16x256xf32>
    %17 = vector.extract_strided_slice %13 {offsets = [20, 0], sizes = [1, 256], strides = [1, 1]} : vector<21x256xf32> to vector<1x256xf32>
    %18 = arith.mulf %10, %10 : vector<16x256xf32>
    %cst_11 = arith.constant dense<0.000000e+00> : vector<256xf32>
    %19 = vector.multi_reduction <add>, %18, %cst_11 [0] : vector<16x256xf32> to vector<256xf32>
    %20 = vector.shape_cast %19 : vector<256xf32> to vector<1x256xf32>
    %cst_12 = arith.constant 9.99999996E-13 : f32
    %21 = vector.broadcast %cst_12 : f32 to vector<1x256xf32>
    %22 = arith.addf %20, %21 : vector<1x256xf32>
    %23 = math.rsqrt %22 : vector<1x256xf32>
    %24 = vector.broadcast %23 : vector<1x256xf32> to vector<16x256xf32>
    %25 = arith.mulf %10, %24 : vector<16x256xf32>
    %26 = arith.truncf %25 : vector<16x256xf32> to vector<16x256xbf16>
    %cst_13 = arith.constant dense<0.000000e+00> : vector<256xf32>
    %27 = vector.multi_reduction <add>, %25, %cst_13 [0] : vector<16x256xf32> to vector<256xf32>
    %28 = vector.shape_cast %27 : vector<256xf32> to vector<1x256xf32>
    %cst_14 = arith.constant 9.99999997E-7 : f32
    %29 = vector.broadcast %cst_14 : f32 to vector<1x256xf32>
    %30 = arith.addf %28, %29 : vector<1x256xf32>
    %31 = vector.broadcast %30 : vector<1x256xf32> to vector<16x256xf32>
    %32 = arith.mulf %25, %31 : vector<16x256xf32>
    %cst_15 = arith.constant dense<0.000000e+00> : vector<16xf32>
    %33 = vector.multi_reduction <add>, %32, %cst_15 [1] : vector<16x256xf32> to vector<16xf32>
    %34 = vector.shape_cast %33 : vector<16xf32> to vector<16x1xf32>
    %cst_16 = arith.constant 2.560000e+02 : f32
    %35 = vector.broadcast %cst_16 : f32 to vector<16x1xf32>
    %36 = arith.addf %35, %34 : vector<16x1xf32>
    %37 = tpu.reciprocal %36 {approx = true} : vector<16x1xf32> -> vector<16x1xf32>
    %cst_17 = arith.constant dense<0.000000e+00> : vector<16x16xf32>
    %38 = tpu.matmul %11, %26, %cst_17 {dimension_numbers = #tpu.dot_dimension_numbers<[1], [1], [0], [0], [0, 0, 1, 0], [], []>} : vector<16x256xbf16>, vector<16x256xbf16>, vector<16x16xf32> -> vector<16x16xf32>
    %39 = arith.truncf %38 : vector<16x16xf32> to vector<16x16xbf16>
    %cst_18 = arith.constant dense<0.000000e+00> : vector<16x256xf32>
    %40 = tpu.matmul %39, %26, %cst_18 {dimension_numbers = #tpu.dot_dimension_numbers<[1], [0], [0], [1], [0, 0, 1, 1], [], []>} : vector<16x16xbf16>, vector<16x256xbf16>, vector<16x256xf32> -> vector<16x256xf32>
    %41 = vector.broadcast %17 : vector<1x256xf32> to vector<16x256xf32>
    %42 = arith.addf %41, %40 : vector<16x256xf32>
    %43 = vector.broadcast %37 : vector<16x1xf32> to vector<16x256xf32>
    %44 = arith.mulf %42, %43 : vector<16x256xf32>
    %45 = vector.broadcast %0 : f32 to vector<16x256xf32>
    %46 = arith.mulf %45, %44 : vector<16x256xf32>
    %47 = arith.addf %10, %46 : vector<16x256xf32>
    %48 = arith.mulf %14, %14 : vector<2x256xf32>
    %cst_19 = arith.constant dense<0.000000e+00> : vector<256xf32>
    %49 = vector.multi_reduction <add>, %48, %cst_19 [0] : vector<2x256xf32> to vector<256xf32>
    %50 = vector.shape_cast %49 : vector<256xf32> to vector<1x256xf32>
    %cst_20 = arith.constant 9.99999996E-13 : f32
    %51 = vector.broadcast %cst_20 : f32 to vector<1x256xf32>
    %52 = arith.addf %50, %51 : vector<1x256xf32>
    %53 = math.rsqrt %52 : vector<1x256xf32>
    %54 = vector.broadcast %53 : vector<1x256xf32> to vector<2x256xf32>
    %55 = arith.mulf %14, %54 : vector<2x256xf32>
    %56 = arith.mulf %15, %15 : vector<2x256xf32>
    %cst_21 = arith.constant dense<0.000000e+00> : vector<256xf32>
    %57 = vector.multi_reduction <add>, %56, %cst_21 [0] : vector<2x256xf32> to vector<256xf32>
    %58 = vector.shape_cast %57 : vector<256xf32> to vector<1x256xf32>
    %cst_22 = arith.constant 9.99999996E-13 : f32
    %59 = vector.broadcast %cst_22 : f32 to vector<1x256xf32>
    %60 = arith.addf %58, %59 : vector<1x256xf32>
    %61 = math.rsqrt %60 : vector<1x256xf32>
    %62 = vector.broadcast %61 : vector<1x256xf32> to vector<2x256xf32>
    %63 = arith.mulf %15, %62 : vector<2x256xf32>
    %cst_23 = arith.constant dense<0.000000e+00> : vector<2xf32>
    %64 = vector.multi_reduction <add>, %63, %cst_23 [1] : vector<2x256xf32> to vector<2xf32>
    %65 = vector.shape_cast %64 : vector<2xf32> to vector<2x1xf32>
    %cst_24 = arith.constant 9.99999997E-7 : f32
    %66 = vector.broadcast %cst_24 : f32 to vector<2x1xf32>
    %67 = arith.addf %65, %66 : vector<2x1xf32>
    %68 = vector.broadcast %67 : vector<2x1xf32> to vector<2x256xf32>
    %69 = arith.mulf %55, %68 : vector<2x256xf32>
    %cst_25 = arith.constant dense<0.000000e+00> : vector<256xf32>
    %70 = vector.multi_reduction <add>, %69, %cst_25 [0] : vector<2x256xf32> to vector<256xf32>
    %71 = vector.shape_cast %70 : vector<256xf32> to vector<1x256xf32>
    %cst_26 = arith.constant 2.560000e+02 : f32
    %72 = vector.broadcast %cst_26 : f32 to vector<1x256xf32>
    %73 = arith.addf %72, %71 : vector<1x256xf32>
    %74 = tpu.reciprocal %73 {approx = true} : vector<1x256xf32> -> vector<1x256xf32>
    %cst_27 = arith.constant dense<0.000000e+00> : vector<16xf32>
    %75 = vector.multi_reduction <add>, %16, %cst_27 [1] : vector<16x256xf32> to vector<16xf32>
    %76 = vector.shape_cast %75 : vector<16xf32> to vector<16x1xf32>
    %77 = arith.truncf %16 : vector<16x256xf32> to vector<16x256xbf16>
    %78 = arith.truncf %63 : vector<2x256xf32> to vector<2x256xbf16>
    %cst_28 = arith.constant dense<0.000000e+00> : vector<16x2xf32>
    %79 = tpu.matmul %77, %78, %cst_28 {dimension_numbers = #tpu.dot_dimension_numbers<[1], [1], [0], [0], [0, 0, 1, 0], [], []>} : vector<16x256xbf16>, vector<2x256xbf16>, vector<16x2xf32> -> vector<16x2xf32>
    %80 = arith.truncf %79 : vector<16x2xf32> to vector<16x2xbf16>
    %81 = arith.truncf %55 : vector<2x256xf32> to vector<2x256xbf16>
    %cst_29 = arith.constant dense<0.000000e+00> : vector<16x256xf32>
    %82 = tpu.matmul %80, %81, %cst_29 {dimension_numbers = #tpu.dot_dimension_numbers<[1], [0], [0], [1], [0, 0, 1, 1], [], []>} : vector<16x2xbf16>, vector<2x256xbf16>, vector<16x256xf32> -> vector<16x256xf32>
    %83 = vector.broadcast %76 : vector<16x1xf32> to vector<16x256xf32>
    %84 = arith.addf %83, %82 : vector<16x256xf32>
    %85 = vector.broadcast %74 : vector<1x256xf32> to vector<16x256xf32>
    %86 = arith.mulf %84, %85 : vector<16x256xf32>
    %87 = vector.broadcast %1 : f32 to vector<16x256xf32>
    %88 = arith.mulf %87, %86 : vector<16x256xf32>
    %89 = arith.addf %10, %88 : vector<16x256xf32>
    %90 = arith.addf %47, %89 : vector<16x256xf32>
    %c0_30 = arith.constant 0 : index
    %c0_31 = arith.constant 0 : index
    %c0_32 = arith.constant 0 : index
    %91 = vector.load %arg7[%c0_30, %c0_31, %c0_32] : memref<1x16x256xf32, #tpu.memory_space<vmem>>, vector<1x16x256xf32>
    %92 = vector.shape_cast %91 : vector<1x16x256xf32> to vector<16x256xf32>
    %93 = vector.shape_cast %90 : vector<16x256xf32> to vector<1x16x256xf32>
    tpu.vector_store %arg7[%c0_30, %c0_31, %c0_32], %93 {strides = array<i32>} : memref<1x16x256xf32, #tpu.memory_space<vmem>>, vector<1x16x256xf32>,
    return
  }
  func.func @transform_0(%arg0: i32) -> (i32, i32, i32) {
    %c0_i32 = arith.constant 0 : i32
    %c0_i32_0 = arith.constant 0 : i32
    %c0_i32_1 = arith.constant 0 : i32
    return %arg0, %c0_i32, %c0_i32_0 : i32, i32, i32
  }
  func.func @transform_1(%arg0: i32) -> (i32, i32, i32) {
    %c0_i32 = arith.constant 0 : i32
    %c0_i32_0 = arith.constant 0 : i32
    %c0_i32_1 = arith.constant 0 : i32
    return %arg0, %c0_i32, %c0_i32_0 : i32, i32, i32
  }
  func.func @transform_2(%arg0: i32) -> (i32, i32) {
    %c0_i32 = arith.constant 0 : i32
    %c0_i32_0 = arith.constant 0 : i32
    %c0_i32_1 = arith.constant 0 : i32
    return %c0_i32, %c0_i32_0 : i32, i32
  }
  func.func @transform_3(%arg0: i32) -> (i32, i32) {
    %c0_i32 = arith.constant 0 : i32
    %c0_i32_0 = arith.constant 0 : i32
    %c0_i32_1 = arith.constant 0 : i32
    return %c0_i32, %c0_i32_0 : i32, i32
  }
  func.func @transform_4(%arg0: i32) -> i32 {
    %c0_i32 = arith.constant 0 : i32
    %c0_i32_0 = arith.constant 0 : i32
    return %c0_i32 : i32
  }
  func.func @transform_5(%arg0: i32) -> i32 {
    %c0_i32 = arith.constant 0 : i32
    %c0_i32_0 = arith.constant 0 : i32
    return %c0_i32 : i32
  }
  func.func @transform_6(%arg0: i32) -> (i32, i32, i32) {
    %c0_i32 = arith.constant 0 : i32
    %c0_i32_0 = arith.constant 0 : i32
    %c0_i32_1 = arith.constant 0 : i32
    return %arg0, %c0_i32, %c0_i32_0 : i32, i32, i32
  }
}

</mosaic_0001>

<bundles_post_ra>
// kernel: af_module.1
= control target key start
LH: loop header
LB: loop body
LE: loop exit
PB: predicated region body
PF: predicated region fallthrough
CT: control target
= control target key end

     0   :  { %s1006_s25 = smov 0   ;;  %s1142_s0 = inlined_call_operand.vmem [shape: f32[2,16,256], index: 0, kind: input, shape index: {}]   ;;  %s1143_s1 = inlined_call_operand.vmem [shape: f32[2,16,256], index: 1, kind: input, shape index: {}]   ;;  %s1144_s2 = inlined_call_operand.vmem [shape: bf16[21,16], index: 2, kind: input, shape index: {}]   ;;  %s1145_s3 = inlined_call_operand.vmem [shape: f32[21,1], index: 3, kind: input, shape index: {}]   ;;  %s1146_s4 = inlined_call_operand.<no memory space> [shape: f32[1], index: 4, kind: input, shape index: {}]   ;;  %s1147_s5 = inlined_call_operand.<no memory space> [shape: f32[1], index: 5, kind: input, shape index: {}]   ;;  %s1148_s6 = inlined_call_operand.vmem [shape: f32[2,16,256], index: 6, kind: output, shape index: {}]  }
   0x1   :  { %11 = sst [smem:[#allocation2]] %s1146_s4 }
   0x2   :  { %12 = sst [smem:[#allocation3]] %s1147_s5 }
   0x3 LB: > { %s900_s26 = sadd.s32 4294967295, %s962_s25   ;;  %p904_p0 = scmp.ge.s32.totalorder %s962_s25, 1  ;;  %s962_s25 = sphi %s1006_s25, %s18_s25  }
   0x4   : > { %p224_p1 = scmp.lt.s32.totalorder %s962_s25, 3 }
   0x6   : > { %p225_p2 = pnand %p904_p0, %p224_p1 }
   0x7   : > { %p259_p3 = scmp.lt.s32.totalorder (!%p225_p2), %s900_s26, 1  ;;  %v964_v0 = vmov (!%p225_p2), 0   ;;  %v280_v1 = vld [vmem:[%s1145_s3] sm:$0xff] (!%p225_p2)  ;;  %v281_v2 = vld [vmem:[%s1145_s3 + $0x8] sm:$0xff] (!%p225_p2)  ;;  %v282_v3 = vld [vmem:[%s1145_s3 + $0x10] sm:$0x1f] (!%p225_p2) }
   0x8   : > { %228 = sbr.rel (%p225_p2) target bundleno = 735 (0x2df), region = 44  ;;  %359 = vmatprep.mubr.bf16.mxu0 (!%p225_p2), %v964_v0  ;;  %932 = vset.pattern.permute.xlu0 (!%p225_p2), %v964_v0  ;;  %v934_v22 = vld [vmem:[%s1144_s2] sm:$0xff] (!%p225_p2)   ;;  %vm320_vm0 = vcmask (!%p225_p2), 130048   ;;  %v935_v31 = vld [vmem:[%s1144_s2 + $0x8] ss:$0 sps:$4 sm:$0x77] (!%p225_p2)  }
   0x9   : > { %285 = vperm.xlu0 (!%p225_p2), %932, %v280_v1   ;;  %933 = vset.pattern.permute.xlu1 (!%p225_p2), %v964_v0  ;;  %vm628_vm1 = vcmask (!%p225_p2), 1047556   ;;  %vm551_vm2 = vcmask (!%p225_p2), 1041408   ;;  %vm637_vm3 = vcmask (!%p225_p2), 1043456   ;;  %vm653_vm4 = vcmask (!%p225_p2), 1045504   ;;  %s276_s18 = sld [smem:[#allocation3]] (!%p225_p2) }
   0xa   : > { %295 = vperm.xlu1 (!%p225_p2), %933, %v282_v3   ;;  %vm598_vm5 = vcmask (!%p225_p2), 1043458   ;;  %vm716_vm6 = vcmask (!%p225_p2), 1040384   ;;  %vm712_vm7 = vcmask (!%p225_p2), 15360   ;;  %s275_s19 = sld [smem:[#allocation2]] (!%p225_p2) }
   0xd   : > { %290 = vperm.xlu0 (!%p225_p2), %932, %v281_v2  }
   0xf   : > { %s1150_s26 = smov (!%p259_p3, %s900_s26), 1 }
  0x10   : > { %s1026_s7 = sshll.u32 %s1150_s26, 5 }
  0x11   : > { %s263_s10 = scalar_lea.vmem %s1142_s0, %s1026_s7  ;;  %s268_s13 = scalar_lea.vmem %s1143_s1, %s1026_s7 }
  0x12   : > { %v299_v4 = vld [vmem:[%s263_s10 + $0x8] sm:$0xff]  ;;  %v301_v5 = vld [vmem:[%s263_s10 + $0x18] sm:$0xff]  ;;  %v298_v9 = vld [vmem:[%s263_s10] sm:$0xff]  ;;  %s273_s22 = scalar_lea.vmem %s1148_s6, %s1026_s7 }
  0x13   : > { %v303_v6 = vld [vmem:[%s268_s13 + $0x8] sm:$0xff]  ;;  %v305_v7 = vld [vmem:[%s268_s13 + $0x18] sm:$0xff]  ;;  %v300_v10 = vld [vmem:[%s263_s10 + $0x10] sm:$0xff] }
  0x14   : > { %v1036_v8 = vadd.f32 %v303_v6, %v299_v4  ;;  %v1038_v11 = vadd.f32 %v305_v7, %v301_v5  ;;  %v302_v12 = vld [vmem:[%s268_s13] sm:$0xff]  ;;  %v304_v13 = vld [vmem:[%s268_s13 + $0x10] sm:$0xff] }
  0x15   : > { %v1040_v14 = vadd.f32 %v302_v12, %v298_v9  ;;  %v1042_v15 = vadd.f32 %v304_v13, %v300_v10 }
  0x16   : > { %v379_v16 = vmul.f32 %v1036_v8, %v1036_v8  ;;  %v311_v17 = vpack.c.bf16 %v1038_v11, %v1036_v8  ;;  %v381_v18 = vmul.f32 %v1038_v11, %v1038_v11 }
  0x17   : > { %v310_v19 = vpack.c.bf16 %v1042_v15, %v1040_v14  ;;  %v378_v20 = vmul.f32 %v1040_v14, %v1040_v14  ;;  %v380_v21 = vmul.f32 %v1042_v15, %v1042_v15 }
  0x18   : > { %327 = vmatprep.subr.bf16.mxu0 %v311_v17  ;;  %v389_v23 = vadd.f32 %v381_v18, %v379_v16  ;;  %468 = vmatprep.mubr.bf16.mxu1 %v311_v17 }
  0x19   : > { %328 = vmatpush1.bf16.msra.mxu0 %v310_v19  ;;  %v382_v24 = vadd.f32 %v380_v21, %v378_v20 }
  0x1a   : > { %v390_v25 = vrot.slane %v389_v23, 4 }
  0x1b   : > { %v383_v26 = vrot.slane %v382_v24, 4 }
  0x1c   : > { %913 = vmatmul.mubr.msk.bf16.vlgmr.msra.gmra.mrb[0].mxu0 %vm320_vm0, %v934_v22  ;;  %v391_v27 = vadd.f32 %v390_v25, %v389_v23 }
  0x1d   : > { %369 = vmatprep.mubr.bf16.mxu0 %v964_v0  ;;  %v384_v28 = vadd.f32 %v383_v26, %v382_v24 }
  0x1e   : > { %v392_v29 = vrot.slane %v391_v27, 2 }
  0x1f   : > { %v385_v30 = vrot.slane %v384_v28, 2 }
  0x20   : > { %v393_v32 = vadd.f32 %v392_v29, %v391_v27 }
  0x21   : > { %v386_v33 = vadd.f32 %v385_v30, %v384_v28 }
  0x22   : > { %v394_v34 = vrot.slane %v393_v32, 1 }
  0x23   : > { %v387_v35 = vrot.slane %v386_v33, 1 }
  0x24   : > { %914 = vmatmul.mubr.msk.bf16.gmra.mrb[4].mxu0 %vm320_vm0, %v935_v31  ;;  %v395_v36 = vadd.f32 %v394_v34, %v393_v32 }
  0x25   : > { %v388_v37 = vadd.f32 %v387_v35, %v386_v33 }
  0x26   : > { %v397_v38 = vadd.f32 1e-12, %v395_v36 }
  0x27   : > { %v396_v39 = vadd.f32 1e-12, %v388_v37 }
  0x28   : > { %936 = vrsqrt.f32 %v397_v38 }
  0x29   : > { %938 = vrsqrt.f32 %v396_v39 }
  0x32   : > { %v937_v40 = vpop.eup %936 }
  0x33   : > { %v939_v41 = vpop.eup %938  ;;  %v401_v42 = vmul.f32 %v937_v40, %v1036_v8  ;;  %v403_v43 = vmul.f32 %v937_v40, %v1038_v11 }
  0x34   : > { %v400_v44 = vmul.f32 %v939_v41, %v1040_v14  ;;  %v402_v45 = vmul.f32 %v939_v41, %v1042_v15 }
  0x35   : > { %v405_v46 = vpack.c.bf16 %v403_v43, %v401_v42  ;;  %v413_v47 = vadd.f32 %v403_v43, %v401_v42 }
  0x36   : > { %v404_v48 = vpack.c.bf16 %v402_v45, %v400_v44  ;;  %v406_v49 = vadd.f32 %v402_v45, %v400_v44 }
  0x37   : > { %436 = vmatprep.subr.bf16.mxu1 %v405_v46  ;;  %v414_v50 = vrot.slane %v413_v47, 4 }
  0x38   : > { %437 = vmatpush1.bf16.xpose.msra.mxu1 %v404_v48  ;;  %v407_v51 = vrot.slane %v406_v49, 4 }
  0x39   : > { %v415_v52 = vadd.f32 %v414_v50, %v413_v47  ;;  %481 = vmatprep.subr.bf16.mxu1 %v405_v46 }
  0x3a   : > { %v408_v53 = vadd.f32 %v407_v51, %v406_v49 }
  0x3b   : > { %v416_v54 = vrot.slane %v415_v52, 2 }
  0x3c   : > { %v409_v55 = vrot.slane %v408_v53, 2 }
  0x3d   : > { %v417_v56 = vadd.f32 %v416_v54, %v415_v52 }
  0x3e   : > { %v410_v57 = vadd.f32 %v409_v55, %v408_v53 }
  0x3f   : > { %469 = vmatmul.mubr.bf16.vlgmr.msra.gmra.mrb[0].mxu1 %v310_v19  ;;  %v418_v58 = vrot.slane %v417_v56, 1 }
  0x40   : > { %v411_v59 = vrot.slane %v410_v57, 1  ;;  %482 = vmatpush1.bf16.msra.mxu1 %v404_v48  ;;  %513 = vmatprep.mubr.bf16.mxu1 %v964_v0 }
  0x41   : > { %v419_v60 = vadd.f32 %v418_v58, %v417_v56 }
  0x42   : > { %v412_v61 = vadd.f32 %v411_v59, %v410_v57 }
  0x43   : > { %v421_v62 = vadd.f32 1e-06, %v419_v60 }
  0x44   : > { %v420_v63 = vadd.f32 1e-06, %v412_v61 }
  0x45   : > { %v423_v1 = vmul.f32 %v421_v62, %v401_v42  ;;  %v425_v5 = vmul.f32 %v421_v62, %v403_v43 }
  0x46   : > { %v422_v2 = vmul.f32 %v420_v63, %v400_v44  ;;  %v424_v4 = vmul.f32 %v420_v63, %v402_v45 }
  0x48   : > { %v426_v3 = vadd.f32 %v423_v1, %v422_v2  ;;  %v429_v6 = vadd.f32 %v425_v5, %v424_v4 }
  0x4a   : > { %427 = vadd.xlane.f32.xlu0 %v426_v3 }
  0x4e   : > { %430 = vadd.xlane.f32.xlu0 %v429_v6 }
  0x88   : > { %v286_v7 = vpop.permute.xlu0 %285 }
  0x89   : > { %v296_v33 = vpop.permute.xlu1 %295 }
  0x8c   : > { %v291_v10 = vpop.permute.xlu0 %290 }
  0xef   : > { %v361_v9 = vpop.f32.mrb[0].mxu0 }
  0xf0   : > { %v1070_v12 = vadd.f32 %v361_v9, %v286_v7  ;;  %v363_v13 = vpop.f32.mrb[1].mxu0 }
  0xf1   : > { %v1072_v16 = vadd.f32 %v363_v13, %v286_v7  ;;  %v365_v17 = vpop.f32.mrb[2].mxu0 }
  0xf2   : > { %v549_v18 = vmul.f32 %v1070_v12, %v1070_v12  ;;  %v366_v19 = vadd.f32 %v365_v17, %v291_v10  ;;  %v367_v20 = vpop.f32.mrb[3].mxu0  ;;  %v629_v21 = vsel %vm628_vm1, %v1070_v12, 0.0 }
  0xf3   : > { %v550_v22 = vmul.f32 %v1072_v16, %v1072_v16  ;;  %v368_v23 = vadd.f32 %v367_v20, %v291_v10  ;;  %v630_v24 = vsel %vm628_vm1, %v1072_v16, 0.0 }
  0xf4   : > { %v552_v25 = vsel %vm551_vm2, %v549_v18, 0.0  ;;  %v574_v26 = vrot.slane %v549_v18, 2  ;;  %v643_v27 = vpack.c.bf16 %v366_v19, %v1070_v12  ;;  %v1082_v28 = vadd.f32 %v630_v24, %v629_v21 }
  0xf5   : > { %v553_v29 = vrot.slane %v552_v25, 4  ;;  %v559_v30 = vsel %vm551_vm2, %v550_v22, 0.0  ;;  %v575_v31 = vrot.slane %v550_v22, 2  ;;  %v644_v32 = vpack.c.bf16 %v368_v23, %v1072_v16 }
  0xf6   : > { %v578_v34 = vsel %vm551_vm2, %v574_v26, 0.0  ;;  %v560_v35 = vrot.slane %v559_v30, 4  ;;  %v634_v36 = vadd.f32 %v368_v23, %v366_v19  ;;  %v654_v47 = vrot.slane %v643_v27, 2 }
  0xf7   : > { %v554_v37 = vadd.f32 %v553_v29, %v552_v25  ;;  %v579_v38 = vrot.slane %v578_v34, 4  ;;  %v585_v39 = vsel %vm551_vm2, %v575_v31, 0.0  ;;  %v371_v40 = vpop.f32.mrb[4].mxu0  ;;  %v657_v1 = vrot.slane %v644_v32, 2 }
  0xf8   : > { %v561_v41 = vadd.f32 %v560_v35, %v559_v30  ;;  %v586_v42 = vrot.slane %v585_v39, 4  ;;  %v1088_v43 = vadd.f32 %v371_v40, %v296_v33  ;;  %635 = vadd.xlane.f32.xlu0 %v634_v36  ;;  %v373_v44 = vpop.f32.mrb[5].mxu0 }
  0xf9   : > { %v555_v45 = vrot.slane %v554_v37, 2  ;;  %v580_v46 = vadd.f32 %v579_v38, %v578_v34  ;;  %v1090_v48 = vadd.f32 %v373_v44, %v296_v33  ;;  %v375_v49 = vpop.f32.mrb[6].mxu0 }
  0xfa   : > { %v562_v50 = vrot.slane %v561_v41, 2  ;;  %v587_v51 = vadd.f32 %v586_v42, %v585_v39  ;;  %v645_v52 = vpack.c.bf16 %v1088_v43, %v1088_v43  ;;  %v376_v53 = vpop.f32.mrb[7].mxu0  ;;  %v638_v54 = vsel %vm637_vm3, %v1088_v43, 0.0 }
  0xfb   : > { %v556_v55 = vadd.f32 %v555_v45, %v554_v37  ;;  %v581_v56 = vrot.slane %v580_v46, 2  ;;  %v646_v57 = vpack.c.bf16 %v1090_v48, %v1090_v48  ;;  %v639_v58 = vsel %vm637_vm3, %v1090_v48, 0.0 }
  0xfc   : > { %v563_v59 = vadd.f32 %v562_v50, %v561_v41  ;;  %v588_v60 = vrot.slane %v587_v51, 2  ;;  %v655_v61 = vrot.slane %v645_v52, 2  ;;  %v640_v62 = vadd.f32 %v639_v58, %v638_v54 }
  0xfd   : > { %v557_v63 = vrot.slane %v556_v55, 1  ;;  %v658_v2 = vrot.slane %v646_v57, 2  ;;  %v582_v3 = vadd.f32 %v581_v56, %v580_v46 }
  0xfe   : > { %v564_v4 = vrot.slane %v563_v59, 1  ;;  %v589_v5 = vadd.f32 %v588_v60, %v587_v51  ;;  %v656_v6 = vsel %vm653_vm4, %v654_v47, %v655_v61 }
  0xff   : > { %v659_v7 = vsel %vm653_vm4, %v657_v1, %v658_v2  ;;  %v583_v9 = vrot.slane %v582_v3, 1  ;;  %v558_v10 = vadd.f32 %v557_v63, %v556_v55 }
 0x100   : > { %v565_v13 = vadd.f32 %v564_v4, %v563_v59  ;;  %700 = vmatprep.mubr.bf16.mxu0 %v659_v7  ;;  %v590_v17 = vrot.slane %v589_v5, 1 }
 0x101   : > { %v584_v18 = vadd.f32 %v583_v9, %v582_v3  ;;  %v566_v19 = vadd.f32 1e-12, %v558_v10 }
 0x102   : > { %v567_v20 = vadd.f32 1e-12, %v565_v13  ;;  %v591_v21 = vadd.f32 %v590_v17, %v589_v5 }
 0x103   : > { %v592_v22 = vadd.f32 1e-12, %v584_v18  ;;  %940 = vrsqrt.f32 %v566_v19 }
 0x104   : > { %942 = vrsqrt.f32 %v567_v20  ;;  %v593_v23 = vadd.f32 1e-12, %v591_v21  ;;  %v428_v20 = vpop.xlane.xlu0 %427 }
 0x105   : > { %944 = vrsqrt.f32 %v592_v22 }
 0x106   : > { %946 = vrsqrt.f32 %v593_v23  ;;  %v432_v23 = vadd.f32 256.0, %v428_v20 }
 0x108   : > { %948 = vrcp.f32 %v432_v23 }
 0x10d   : > { %v941_v24 = vpop.eup %940 }
 0x10e   : > { %v943_v25 = vpop.eup %942  ;;  %v570_v29 = vmul.f32 %v941_v24, %v1070_v12  ;;  %v431_v24 = vpop.xlane.xlu0 %430 }
 0x10f   : > { %v945_v26 = vpop.eup %944  ;;  %v571_v27 = vmul.f32 %v943_v25, %v1072_v16 }
 0x110   : > { %v947_v30 = vpop.eup %946  ;;  %v596_v31 = vmul.f32 %v945_v26, %v1070_v12  ;;  %v710_v40 = vpack.c.bf16 %v570_v29, %v570_v29  ;;  %v433_v26 = vadd.f32 256.0, %v431_v24 }
 0x111   : > { %v711_v32 = vpack.c.bf16 %v571_v27, %v571_v27  ;;  %v597_v33 = vmul.f32 %v947_v30, %v1072_v16  ;;  %v524_v16 = vlaneseq }
 0x112   : > { %v470_v34 = vpop.f32.mrb[0].mxu1  ;;  %v599_v35 = vsel %vm598_vm5, %v596_v31, 0.0  ;;  %v647_v36 = vpack.c.bf16 %v596_v31, %v596_v31  ;;  %v718_v12 = vsel %vm716_vm6, %v710_v40, 0  ;;  %950 = vrcp.f32 %v433_v26 }
 0x113   : > { %v472_v37 = vpop.f32.mrb[1].mxu1  ;;  %916 = vmatprep.subr.msk.bf16.mxu1 %vm716_vm6, %v711_v32  ;;  %v600_v38 = vsel %vm598_vm5, %v597_v33, 0.0  ;;  %v648_v39 = vpack.c.bf16 %v597_v33, %v597_v33  ;;  %v525_v49 = vshrl.u32 %v524_v16, 7  ;;  %v949_v32 = vpop.eup %948 }
 0x114   : > { %v473_v41 = vpop.f32.mrb[2].mxu1  ;;  %v601_v42 = vadd.f32 %v600_v38, %v599_v35  ;;  %v664_v47 = vrot.slane %v647_v36, 1 }
 0x115   : > { %v477_v44 = vpack.c.bf16 %v473_v41, %v470_v34  ;;  %v665_v45 = vrot.slane %v648_v39, 1  ;;  %v475_v46 = vpop.f32.mrb[3].mxu1  ;;  %v526_v50 = vsub.s32 4, %v525_v49 }
 0x116   : > { %602 = vadd.xlane.f32.xlu1 %v601_v42 }
 0x117   : > { %915 = vmatmul.mubr.msk.bf16.vlgmr.msra.gmra.mrb[4].mxu1 %vm320_vm0, %v477_v44  ;;  %668 = vmatprep.subr.bf16.mxu0 %v665_v45  ;;  %v527_v51 = vrot.slane %v1088_v43, %v526_v50  ;;  %v531_v53 = vrot.slane %v1090_v48, %v526_v50 }
 0x118   : > { %724 = vmatpush1.bf16.msra.mxu1 %v718_v12  ;;  %669 = vmatpush1.bf16.xpose.msra.mxu0 %v664_v47 }
 0x119   : > { %755 = vmatprep.mubr.bf16.mxu1 %v964_v0 }
 0x11a   : > { %632 = vadd.xlane.f32.xlu1 %v1082_v28 }
 0x11c   : > { %v951_v34 = vpop.eup %950 }
 0x11e   : > { %641 = vadd.xlane.f32.xlu1 %v640_v62 }
 0x11f   : > { %701 = vmatmul.mubr.bf16.vlgmr.msra.gmra.mrb[8].mxu0 %v656_v6 }
 0x185   : > { %v636_v49 = vpop.xlane.xlu0 %635 }
 0x1a3   : > { %v603_v43 = vpop.xlane.xlu1 %602 }
 0x1a4   : > { %v604_v1 = vadd.f32 1e-06, %v603_v43 }
 0x1a6   : > { %v606_v2 = vrot.slane %v604_v1, 2 }
 0x1a7   : > { %v633_v31 = vpop.xlane.xlu1 %632 }
 0x1a8   : > { %v608_v48 = vmul.f32 %v606_v2, %v570_v29  ;;  %v609_v3 = vmul.f32 %v606_v2, %v571_v27 }
 0x1aa   : > { %v610_v4 = vsel %vm551_vm2, %v608_v48, 0.0  ;;  %v617_v5 = vsel %vm551_vm2, %v609_v3, 0.0 }
 0x1ab   : > { %v611_v6 = vrot.slane %v610_v4, 4  ;;  %v618_v7 = vrot.slane %v617_v5, 4  ;;  %v642_v44 = vpop.xlane.xlu1 %641 }
 0x1ad   : > { %v612_v9 = vadd.f32 %v611_v6, %v610_v4  ;;  %v619_v10 = vadd.f32 %v618_v7, %v617_v5 }
 0x1af   : > { %v613_v13 = vrot.slane %v612_v9, 2  ;;  %v620_v17 = vrot.slane %v619_v10, 2 }
 0x1b1   : > { %v614_v18 = vadd.f32 %v613_v13, %v612_v9  ;;  %v621_v19 = vadd.f32 %v620_v17, %v619_v10 }
 0x1b3   : > { %v615_v21 = vrot.slane %v614_v18, 1  ;;  %v622_v22 = vrot.slane %v621_v19, 1 }
 0x1b5   : > { %v616_v25 = vadd.f32 %v615_v21, %v614_v18  ;;  %v623_v27 = vadd.f32 %v622_v22, %v621_v19 }
 0x1b7   : > { %v624_v29 = vadd.f32 256.0, %v616_v25  ;;  %v625_v30 = vadd.f32 256.0, %v623_v27 }
 0x1b9   : > { %952 = vrcp.f32 %v624_v29 }
 0x1ba   : > { %954 = vrcp.f32 %v625_v30 }
 0x1c3   : > { %v953_v42 = vpop.eup %952 }
 0x1c4   : > { %v955_v16 = vpop.eup %954 }
 0x1ea   : > { %v515_v52 = vpop.f32.mrb[4].mxu1 }
 0x1eb   : > { %v532_v54 = vadd.f32 %v527_v51, %v515_v52  ;;  %v517_v55 = vpop.f32.mrb[5].mxu1 }
 0x1ec   : > { %v1113_v56 = vadd.f32 %v531_v53, %v517_v55  ;;  %v519_v57 = vpop.f32.mrb[6].mxu1 }
 0x1ed   : > { %v534_v58 = vadd.f32 %v527_v51, %v519_v57  ;;  %v521_v59 = vpop.f32.mrb[7].mxu1  ;;  %v536_v45 = vmul.f32 %v949_v32, %v532_v54  ;;  %v794_v51 = vstv %s276_s18 }
 0x1ee   : > { %v1115_v0 = vadd.f32 %v531_v53, %v521_v59 }
 0x1ef   : > { %v538_v46 = vmul.f32 %v951_v34, %v534_v58 }
 0x1f0   : > { %v539_v58 = vmul.f32 %v951_v34, %v1115_v0 }
 0x1f2   : > { %v702_v28 = vpop.f32.mrb[8].mxu0 }
 0x1f3   : > { %v704_v60 = vpop.f32.mrb[9].mxu0 }
 0x1f4   : > { %v705_v61 = vpop.f32.mrb[10].mxu0  ;;  %v540_v60 = vstv %s275_s19 }
 0x1f5   : > { %v709_v62 = vpack.c.bf16 %v705_v61, %v702_v28  ;;  %v707_v63 = vpop.f32.mrb[11].mxu0  ;;  %v537_v61 = vmul.f32 %v949_v32, %v1113_v56  ;;  %v541_v4 = vmul.f32 %v540_v60, %v536_v45  ;;  %v543_v5 = vmul.f32 %v540_v60, %v538_v46 }
 0x1f6   : > { %v544_v17 = vmul.f32 %v540_v60, %v539_v58 }
 0x1f7   : > { %917 = vmatmul.mubr.msk.bf16.vlgmr.msra.gmra.mrb[8].mxu1 %vm712_vm7, %v709_v62  ;;  %v542_v9 = vmul.f32 %v540_v60, %v537_v61  ;;  %v545_v21 = vadd.f32 %v541_v4, %v1040_v14  ;;  %v547_v22 = vadd.f32 %v543_v5, %v1042_v15 }
 0x1f9   : > { %v546_v30 = vadd.f32 %v542_v9, %v1036_v8 }
 0x2ca   : > { %v757_v33 = vpop.f32.mrb[8].mxu1 }
 0x2cb   : > { %v770_v35 = vrot.slane %v757_v33, 4  ;;  %v759_v36 = vpop.f32.mrb[9].mxu1 }
 0x2cc   : > { %v771_v37 = vrot.slane %v759_v36, 4  ;;  %v761_v38 = vpop.f32.mrb[10].mxu1 }
 0x2cd   : > { %v782_v39 = vadd.f32 %v770_v35, %v633_v31  ;;  %v772_v40 = vrot.slane %v761_v38, 4  ;;  %v763_v41 = vpop.f32.mrb[11].mxu1 }
 0x2ce   : > { %v783_v47 = vadd.f32 %v771_v37, %v633_v31  ;;  %v774_v12 = vrot.slane %v763_v41, 4  ;;  %v548_v31 = vadd.f32 %v544_v17, %v1038_v11 }
 0x2cf   : > { %v788_v50 = vmul.f32 %v953_v42, %v782_v39  ;;  %v773_v52 = vsel %vm637_vm3, %v770_v35, %v772_v40  ;;  %v786_v53 = vadd.f32 %v772_v40, %v642_v44 }
 0x2d0   : > { %v789_v55 = vmul.f32 %v955_v16, %v783_v47  ;;  %v784_v57 = vadd.f32 %v773_v52, %v636_v49  ;;  %v775_v59 = vsel %vm637_vm3, %v771_v37, %v774_v12  ;;  %v787_v28 = vadd.f32 %v774_v12, %v642_v44 }
 0x2d1   : > { %v792_v62 = vmul.f32 %v953_v42, %v786_v53  ;;  %v785_v54 = vadd.f32 %v775_v59, %v636_v49  ;;  %v795_v63 = vmul.f32 %v794_v51, %v788_v50 }
 0x2d2   : > { %v790_v43 = vmul.f32 %v953_v42, %v784_v57  ;;  %v793_v1 = vmul.f32 %v955_v16, %v787_v28  ;;  %v796_v2 = vmul.f32 %v794_v51, %v789_v55 }
 0x2d3   : > { %v799_v48 = vmul.f32 %v794_v51, %v792_v62  ;;  %v791_v3 = vmul.f32 %v955_v16, %v785_v54  ;;  %v807_v56 = vrot.slane %v795_v63, 4 }
 0x2d4   : > { %v797_v6 = vmul.f32 %v794_v51, %v790_v43  ;;  %v800_v7 = vmul.f32 %v794_v51, %v793_v1  ;;  %v810_v20 = vrot.slane %v796_v2, 4 }
 0x2d5   : > { %v813_v10 = vrot.slane %v799_v48, 4  ;;  %v798_v13 = vmul.f32 %v794_v51, %v791_v3 }
 0x2d6   : > { %v808_v18 = vrot.slane %v797_v6, 4  ;;  %v815_v19 = vrot.slane %v800_v7, 4 }
 0x2d7   : > { %v811_v0 = vrot.slane %v798_v13, 4 }
 0x2d8   : > { %v809_v23 = vsel %vm637_vm3, %v807_v56, %v808_v18  ;;  %v814_v24 = vsel %vm637_vm3, %v808_v18, %v813_v10 }
 0x2d9   : > { %v821_v25 = vadd.f32 %v809_v23, %v1040_v14  ;;  %v823_v26 = vadd.f32 %v814_v24, %v1042_v15  ;;  %v812_v27 = vsel %vm637_vm3, %v810_v20, %v811_v0  ;;  %v816_v29 = vsel %vm637_vm3, %v811_v0, %v815_v19 }
 0x2da   : > { %v822_v32 = vadd.f32 %v812_v27, %v1036_v8  ;;  %v824_v33 = vadd.f32 %v816_v29, %v1038_v11 }
 0x2db   : > { %v825_v34 = vadd.f32 %v821_v25, %v545_v21  ;;  %v827_v14 = vadd.f32 %v823_v26, %v547_v22 }
 0x2dc   : > { %v826_v35 = vadd.f32 %v822_v32, %v546_v30  ;;  %v828_v15 = vadd.f32 %v824_v33, %v548_v31 }
 0x2dd   : > { %829 = vst [vmem:[%s273_s22] sm:$0xff] %v825_v34  ;;  %831 = vst [vmem:[%s273_s22 + $0x10] sm:$0xff] %v827_v14 }
 0x2de   : > { %830 = vst [vmem:[%s273_s22 + $0x8] sm:$0xff] %v826_v35  ;;  %832 = vst [vmem:[%s273_s22 + $0x18] sm:$0xff] %v828_v15 }
 0x2df PF: > { %s18_s25 = sadd.s32 1, %s962_s25  }
 0x2e0   : > { %p15_p4 = scmp.ge.s32.totalorder %s18_s25, 4  }
 0x2e2   :  { %17 = sbr.rel (!%p15_p4) target bundleno = 3 (0x3), region = 77 }

</bundles_post_ra>
